<compile_context>
chip_gen: v6e
topology: v6e:2x2x1
jax: 0.10.0
libtpu: 0.0.40
codegen_flags: <defaults>
</compile_context>

<pallas_src>
import functools

import jax
import jax.numpy as jnp
from jax.experimental import pallas as pl
from jax.experimental.pallas import tpu as pltpu


# ---------------------------------------------------------------------------
# small helpers
# ---------------------------------------------------------------------------
def _round_up(x: int, m: int) -> int:
    return ((x + m - 1) // m) * m


def _round_down(x: int, m: int) -> int:
    return max(m, (x // m) * m)


def _device_kind() -> str:
    try:
        return str(jax.devices()[0].device_kind).lower()
    except Exception:
        return ""


def _vmem_capacity_bytes() -> int:
    # Conservative fallback (64 MiB = v7x per-TC VMEM) if the query fails.
    try:
        return int(pltpu.get_tpu_info().vmem_capacity_bytes)
    except Exception:
        return 64 * 1024 * 1024


def _sublane(itemsize: int) -> int:
    # Sublane packing of the second-minor axis: 8 rows (f32), 16 (bf16), 32 (i8).
    return max(8, 32 // max(int(itemsize), 1))


def _pick_row_tile(rows: int, hidden: int, itemsize: int,
                   vmem_bytes: int, multi_tc: bool) -> int:
    sub = _sublane(itemsize)
    # big tiles amortize the ~0.35us per-grid-step overhead (mem-bound kernel)
    target_block_bytes = max(vmem_bytes // 8, 1 << 22)
    # double-buffered in + out in the I/O dtype plus f32 temps per element
    bytes_per_row = hidden * (4 * itemsize + 2 * 4)
    cap = _round_down(target_block_bytes // max(bytes_per_row, 1), sub)
    # Only force a multi-step row split when there are >=2 TensorCores to feed
    # (v4/v5p/v7x megacore); on v5e/v6e keep the single largest block.
    if multi_tc:
        if rows >= 4 * sub:
            cap = min(cap, _round_up(pl.cdiv(rows, 4), sub))
        elif rows >= 2 * sub:
            cap = min(cap, _round_up(pl.cdiv(rows, 2), sub))
    return max(sub, min(cap, _round_up(rows, sub)))


# ---------------------------------------------------------------------------
# kernels
# ---------------------------------------------------------------------------
def _softmax_row_kernel(x_ref, o_ref):
    """Whole-row, numerically-stable softmax on one (row_tile, hidden) block."""
    x = x_ref[...]
    # max in the native dtype is exact (bf16 fast path avoids an f32 copy);
    # the exp/normalize math runs in f32.
    m = jnp.max(x, axis=-1, keepdims=True)
    e = jnp.exp(x.astype(jnp.float32) - m.astype(jnp.float32))
    s = jnp.sum(e, axis=-1, keepdims=True)
    r = 1.0 / s  # exact reciprocal on a (row_tile, 1) column: effectively free
    o_ref[...] = (e * r).astype(o_ref.dtype)


def _softmax_wide_kernel(x_ref, o_ref, m_sc, l_sc, *, hidden, col_tile, ragged_cols):
    """Fused wide-hidden softmax.

    grid = (n_row, 2, n_col).  phase 0: online running max / normalizer over
    column tiles (ragged tail columns masked); at the last tile l_sc becomes
    1/l.  phase 1: o = exp(x - m) * (1/l).  m_sc/l_sc persist in VMEM scratch
    across the row tile, so the stats never touch HBM.
    """
    phase = pl.program_id(1)
    k = pl.program_id(2)
    n_col = pl.num_programs(2)

    @pl.when(phase == 0)
    def _stats():
        @pl.when(k == 0)
        def _init():
            m_sc[...] = jnp.full_like(m_sc, jnp.finfo(jnp.float32).min)
            l_sc[...] = jnp.zeros_like(l_sc)

        x = x_ref[...].astype(jnp.float32)
        if ragged_cols:
            # Mask columns past `hidden` so OOB data in the ragged tail tile
            # cannot corrupt the running max / sum.
            col = k * col_tile + jax.lax.broadcasted_iota(jnp.int32, x.shape, 1)
            x = jnp.where(col < hidden, x, jnp.finfo(jnp.float32).min)

        m_blk = jnp.max(x, axis=-1, keepdims=True)
        m_new = jnp.maximum(m_sc[...], m_blk)
        l_sc[...] = (l_sc[...] * jnp.exp(m_sc[...] - m_new)
                     + jnp.sum(jnp.exp(x - m_new), axis=-1, keepdims=True))
        m_sc[...] = m_new

        @pl.when(k == n_col - 1)
        def _finalize():
            l_sc[...] = 1.0 / l_sc[...]  # store reciprocal once for phase 1

    @pl.when(phase == 1)
    def _normalize():
        # No column mask needed: ragged-tail writes are dropped by Pallas.
        x = x_ref[...].astype(jnp.float32)
        o_ref[...] = (jnp.exp(x - m_sc[...]) * l_sc[...]).astype(o_ref.dtype)


# ---------------------------------------------------------------------------
# pallas_call wrappers
# ---------------------------------------------------------------------------
def _softmax_rows_pallas(x2d: jax.Array, row_tile: int, vmem_limit: int) -> jax.Array:
    rows, hidden = x2d.shape
    itemsize = jnp.dtype(x2d.dtype).itemsize
    # No padding / slicing: Pallas masks the ragged edge row block.
    grid = (pl.cdiv(rows, row_tile),)
    return pl.pallas_call(
        _softmax_row_kernel,
        out_shape=jax.ShapeDtypeStruct((rows, hidden), x2d.dtype),
        grid_spec=pltpu.PrefetchScalarGridSpec(
            num_scalar_prefetch=0,
            grid=grid,
            in_specs=[pl.BlockSpec((row_tile, hidden), lambda i: (i, 0))],
            out_specs=pl.BlockSpec((row_tile, hidden), lambda i: (i, 0)),
        ),
        compiler_params=pltpu.CompilerParams(
            dimension_semantics=("parallel",),
            vmem_limit_bytes=vmem_limit,
        ),
        cost_estimate=pl.CostEstimate(
            flops=5 * rows * hidden,
            transcendentals=rows * hidden,
            bytes_accessed=2 * rows * hidden * itemsize,
        ),
    )(x2d)


def _softmax_rows_pallas_wide(x2d: jax.Array, vmem_bytes: int, vmem_limit: int,
                              col_tile: int | None = None) -> jax.Array:
    """Fused column-tiled online-softmax for vocab-sized hidden (no pad/slice)."""
    rows, hidden = x2d.shape
    dtype = x2d.dtype
    itemsize = jnp.dtype(dtype).itemsize
    sub = _sublane(itemsize)
    row_tile = sub

    if col_tile is None:
        # Generous per-step working set: the kernel is HBM-bandwidth-bound, so
        # the biggest column tile that fits comfortably wins.
        target_block_bytes = max(vmem_bytes // 4, 1 << 22)
        bytes_per_col = row_tile * (4 * itemsize + 2 * 4)
        col_tile = _round_down(target_block_bytes // max(bytes_per_col, 1), 128)
    col_tile = max(128, min(_round_up(col_tile, 128), _round_up(hidden, 128)))

    n_row = pl.cdiv(rows, row_tile)
    n_col = pl.cdiv(hidden, col_tile)
    ragged_cols = (hidden % col_tile) != 0

    kernel = functools.partial(_softmax_wide_kernel, hidden=hidden,
                               col_tile=col_tile, ragged_cols=ragged_cols)

    return pl.pallas_call(
        kernel,
        out_shape=jax.ShapeDtypeStruct((rows, hidden), dtype),
        grid_spec=pltpu.PrefetchScalarGridSpec(
            num_scalar_prefetch=0,
            grid=(n_row, 2, n_col),
            in_specs=[pl.BlockSpec((row_tile, col_tile), lambda i, p, k: (i, k))],
            # phase 0 parks the (unwritten) output on column block 0; phase 1
            # walks the real blocks, so each output block is written exactly
            # once before its writeback.
            out_specs=pl.BlockSpec((row_tile, col_tile), lambda i, p, k: (i, k * p)),
            scratch_shapes=[pltpu.VMEM((row_tile, 1), jnp.float32),   # running max
                            pltpu.VMEM((row_tile, 1), jnp.float32)],  # normalizer / 1/l
        ),
        compiler_params=pltpu.CompilerParams(
            dimension_semantics=("parallel", "arbitrary", "arbitrary"),
            vmem_limit_bytes=vmem_limit,
        ),
        cost_estimate=pl.CostEstimate(
            flops=6 * rows * hidden,
            transcendentals=2 * rows * hidden,
            bytes_accessed=3 * rows * hidden * itemsize,
        ),
    )(x2d)


def liger_softmax(x: jax.Array, min_pallas_hidden: int = 128) -> jax.Array:
    """Softmax over the last axis (forward of LigerKernelSoftmax)."""
    orig_shape = x.shape
    hidden = orig_shape[-1]
    rows = 1
    for d in orig_shape[:-1]:
        rows *= d

    # Lane-sparse tiny last dims (< 128): pallas_call fixed overhead + masked
    # partial stores dominate; plain XLA softmax is the right tool there.
    if hidden < min_pallas_hidden or rows == 0:
        return jax.nn.softmax(x, axis=-1)

    x2d = x.reshape(rows, hidden)
    itemsize = jnp.dtype(x.dtype).itemsize
    kind = _device_kind()
    multi_tc = ("v7" in kind) or ("v4" in kind) or ("v5p" in kind)

    vmem_bytes = _vmem_capacity_bytes()
    if "v7" in kind:
        # v7x: 64 MiB per TensorCore, regardless of what a per-chip query says.
        vmem_bytes = min(vmem_bytes, 64 * 1024 * 1024)
    vmem_limit = int(min((vmem_bytes * 3) // 4, 96 * 1024 * 1024))

    # Can a minimal sublane-aligned row tile hold the whole hidden row?
    sub = _sublane(itemsize)
    min_block_bytes = sub * hidden * (4 * itemsize + 2 * 4)
    if min_block_bytes > vmem_bytes // 8:
        out = _softmax_rows_pallas_wide(x2d, vmem_bytes, vmem_limit)
    else:
        row_tile = _pick_row_tile(rows, hidden, itemsize, vmem_bytes, multi_tc)
        out = _softmax_rows_pallas(x2d, row_tile, vmem_limit)
    return out.reshape(orig_shape)


# TODO(synk): only the forward pass of LigerSoftmaxFunction is implemented
# (no custom VJP); JAX autodiff of the wrapper is not wired up.

if __name__ == "__main__":
    key = jax.random.PRNGKey(0)

    # main test: lane-dense last dim, multi-step row grid (batch=2, seq=8, hidden=128)
    x = jax.random.normal(key, (2, 8, 128), dtype=jnp.float32)
    y = liger_softmax(x)
    jax.block_until_ready(y)
    y_ref = jax.nn.softmax(x, axis=-1)
    assert y.shape == x.shape and y.dtype == x.dtype
    assert jnp.allclose(y, y_ref, atol=2e-5, rtol=2e-5)

    # non-divisible row count -> exercises the ragged edge row block (no pad/slice)
    x2 = jax.random.normal(jax.random.PRNGKey(1), (3, 5, 128), dtype=jnp.float32)
    y2 = liger_softmax(x2)
    jax.block_until_ready(y2)
    assert jnp.allclose(y2, jax.nn.softmax(x2, axis=-1), atol=2e-5, rtol=2e-5)

    # tiny last dim -> dispatches to the XLA fallback path
    x3 = jax.random.normal(jax.random.PRNGKey(2), (2, 8, 32), dtype=jnp.float32)
    y3 = liger_softmax(x3)
    jax.block_until_ready(y3)
    assert jnp.allclose(y3, jax.nn.softmax(x3, axis=-1), atol=2e-5, rtol=2e-5)

    # fused wide path (small forced col_tile): ragged rows + ragged tail column tile
    x4 = jax.random.normal(jax.random.PRNGKey(3), (3, 5, 1000), dtype=jnp.float32)
    y4 = _softmax_rows_pallas_wide(
        x4.reshape(-1, 1000), vmem_bytes=_vmem_capacity_bytes(),
        vmem_limit=64 * 1024 * 1024, col_tile=512,
    ).reshape(x4.shape)
    jax.block_until_ready(y4)
    assert jnp.allclose(y4, jax.nn.softmax(x4, axis=-1), atol=2e-5, rtol=2e-5)

    print("KERNEL_OK")
</pallas_src>

<mosaic_0001>
module attributes {stable_mosaic.version = 11 : i64} {
  func.func @_softmax_row_kernel(%arg0: i32, %arg1: memref<16x128xf32, #tpu.memory_space<vmem>>, %arg2: memref<16x128xf32, #tpu.memory_space<vmem>>) attributes {dimension_semantics = [#tpu.dimension_semantics<parallel>], iteration_bounds = array<i64: 1>, scalar_prefetch = 0 : i64, scratch_operands = 0 : i64, tpu.core_type = #tpu.core_type<tc>, window_params = [{transform_indices = @transform_0, window_bounds = array<i64: 16, 128>}, {transform_indices = @transform_1, window_bounds = array<i64: 16, 128>}]} {
    %c0 = arith.constant 0 : index
    %c0_0 = arith.constant 0 : index
    %0 = vector.load %arg1[%c0, %c0_0] : memref<16x128xf32, #tpu.memory_space<vmem>>, vector<16x128xf32>
    %cst = arith.constant dense<0xFF800000> : vector<16xf32>
    %1 = vector.multi_reduction <maximumf>, %0, %cst [1] : vector<16x128xf32> to vector<16xf32>
    %2 = vector.shape_cast %1 : vector<16xf32> to vector<16x1xf32>
    %3 = vector.broadcast %2 : vector<16x1xf32> to vector<16x128xf32>
    %4 = arith.subf %0, %3 : vector<16x128xf32>
    %5 = math.exp %4 : vector<16x128xf32>
    %cst_1 = arith.constant dense<0.000000e+00> : vector<16xf32>
    %6 = vector.multi_reduction <add>, %5, %cst_1 [1] : vector<16x128xf32> to vector<16xf32>
    %7 = vector.shape_cast %6 : vector<16xf32> to vector<16x1xf32>
    %cst_2 = arith.constant 1.000000e+00 : f32
    %8 = vector.broadcast %cst_2 : f32 to vector<16x1xf32>
    %9 = arith.divf %8, %7 : vector<16x1xf32>
    %10 = vector.broadcast %9 : vector<16x1xf32> to vector<16x128xf32>
    %11 = arith.mulf %5, %10 : vector<16x128xf32>
    %c0_3 = arith.constant 0 : index
    %c0_4 = arith.constant 0 : index
    %12 = vector.load %arg2[%c0_3, %c0_4] : memref<16x128xf32, #tpu.memory_space<vmem>>, vector<16x128xf32>
    tpu.vector_store %arg2[%c0_3, %c0_4], %11 {strides = array<i32>} : memref<16x128xf32, #tpu.memory_space<vmem>>, vector<16x128xf32>,
    return
  }
  func.func @transform_0(%arg0: i32) -> (i32, i32) {
    %c0_i32 = arith.constant 0 : i32
    %c0_i32_0 = arith.constant 0 : i32
    return %arg0, %c0_i32 : i32, i32
  }
  func.func @transform_1(%arg0: i32) -> (i32, i32) {
    %c0_i32 = arith.constant 0 : i32
    %c0_i32_0 = arith.constant 0 : i32
    return %arg0, %c0_i32 : i32, i32
  }
}

</mosaic_0001>

<bundles_post_ra>
// kernel: tpu_custom_call.1
= control target key start
LH: loop header
LB: loop body
LE: loop exit
PB: predicated region body
PF: predicated region fallthrough
CT: control target
= control target key end

     0   :  { %6 = vsyncpa [#allocation3], 0  ;;  %s146_s0 = inlined_call_operand.hbm [shape: f32[16,128], index: 0, kind: input, shape index: {}]   ;;  %s147_s1 = inlined_call_operand.hbm [shape: f32[16,128], index: 1, kind: output, shape index: {}]  }
   0x1   :  { %7 = vsyncpa [#allocation4], 0  ;;  %s120_s6 = smov [#allocation2]  }
   0x2   :  { %s13_s7 = sshll.u32 %s120_s6, 4  ;;  %s14_s7 = int_to_ptr.vmem [resolvable:$true] %s13_s7 }
   0x3   :  { %s84_s8 = scalar_lea.vmem %s14_s7, 256  ;;  %p89_p1 = scmp.lt.s32.totalorder %s14_s7, %s14_s7 }
   0x4   :  { %p85_p0 = scmp.ne.s32.totalorder %s14_s7, %s84_s8  ;;  %p90_p2 = scmp.lt.s32.totalorder %s84_s8, %s84_s8 }
   0x6   :  { %p91_p3 = por %p90_p2, %p89_p1 }
   0x8   :  { %p92_p4 = pnand %p91_p3, %p85_p0 }
   0xa   :  { %95 = shalt.err (!%p92_p4)
}
   0xb   :  { %s121_s9 = smov 128   ;;  %s122_s10 = smov 8  }
   0xc   :  { %19 = dma.hbm_to_vmem [thread:$0]  %s146_s0, 256, %s14_s7, [#allocation3], %s121_s9, %s121_s9, %s122_s10  }
   0xd   :  { %116 = dma.done.wait [#allocation3], 256  }
   0xe   :  { %117 = vsyncadd [#allocation3], 4294967040  ;;  %v23_v0 = vld [vmem:[#allocation2] sm:$0xff]  ;;  %v24_v1 = vld [vmem:[#allocation2 + $0x8] sm:$0xff]  ;;  %s123_s0 = smov [#allocation5]  }
   0xf   :  { %25 = vmax.xlane.f32.xlu0 %v23_v0  ;;  %s52_s13 = sshll.u32 %s123_s0, 4  ;;  %s53_s13 = int_to_ptr.vmem [resolvable:$true] %s52_s13 }
  0x10   :  { %s96_s14 = scalar_lea.vmem %s53_s13, 256  ;;  %p101_p6 = scmp.lt.s32.totalorder %s53_s13, %s53_s13 }
  0x11   :  { %p97_p5 = scmp.ne.s32.totalorder %s53_s13, %s96_s14  ;;  %p102_p7 = scmp.lt.s32.totalorder %s96_s14, %s96_s14 }
  0x13   :  { %27 = vmax.xlane.f32.xlu0 %v24_v1  ;;  %p103_p8 = por %p102_p7, %p101_p6 }
  0x15   :  { %p104_p9 = pnand %p103_p8, %p97_p5 }
  0x98   :  { %v26_v2 = vpop.xlane.xlu0 %25 }
  0x99   :  { %v29_v3 = vsub.f32 %v23_v0, %v26_v2 }
  0x9b   :  { %v31_v4 = vmul.f32 1.442695, %v29_v3 }
  0x9c   :  { %v28_v5 = vpop.xlane.xlu0 %27 }
  0x9d   :  { %68 = vpow2.f32 %v31_v4  ;;  %v30_v6 = vsub.f32 %v24_v1, %v28_v5 }
  0x9f   :  { %v33_v7 = vmul.f32 1.442695, %v30_v6 }
  0xa1   :  { %70 = vpow2.f32 %v33_v7 }
  0xaa   :  { %v69_v8 = vpop.eup %68 }
  0xab   :  { %35 = vadd.xlane.f32.xlu1 %v69_v8 }
  0xae   :  { %v71_v9 = vpop.eup %70 }
  0xaf   :  { %37 = vadd.xlane.f32.xlu1 %v71_v9 }
 0x134   :  { %v36_v10 = vpop.xlane.xlu1 %35 }
 0x135   :  { %72 = vrcp.f32 %v36_v10 }
 0x138   :  { %v38_v11 = vpop.xlane.xlu1 %37 }
 0x139   :  { %74 = vrcp.f32 %v38_v11 }
 0x142   :  { %v73_v12 = vpop.eup %72 }
 0x143   :  { %v43_v13 = vmul.f32 %v73_v12, %v69_v8 }
 0x145   :  { %45 = vst [vmem:[#allocation5] sm:$0xff] %v43_v13 }
 0x146   :  { %v75_v14 = vpop.eup %74 }
 0x147   :  { %v44_v15 = vmul.f32 %v75_v14, %v71_v9 }
 0x149   :  { %46 = vst [vmem:[#allocation5 + $0x8] sm:$0xff] %v44_v15 }
 0x14a   :  { %107 = shalt.err (!%p104_p9)
}
 0x14b   :  { %58 = dma.vmem_to_hbm [thread:$0]  %s53_s13, 256, %s147_s1, [#allocation4], %s121_s9, %s121_s9, %s122_s10  }
 0x14c   :  { %118 = dma.done.wait [#allocation4], 256  }
 0x14d   :  { %119 = vsyncadd [#allocation4], 4294967040 }
 0x14e   :  { %62 = vsyncpa [#allocation3], 1 }
 0x14f   :  { %63 = vsyncpa [#allocation4], 1 }

</bundles_post_ra>
